<compile_context>
chip_gen: v7x
topology: tpu7x:2x2x1
jax: 0.10.0
libtpu: 0.0.40
codegen_flags: <defaults>
</compile_context>

<pallas_src>
import jax
import jax.numpy as jnp
from jax import lax
from jax.experimental import pallas as pl
from jax.experimental.pallas import tpu as pltpu


def _round_up(v, m):
    return (v + m - 1) // m * m


def _scoped_vmem_limit(required_bytes):
    """Clamp an explicit scoped-VMEM request to the chip's physical capacity."""
    try:
        cap = int(pltpu.get_tpu_info().vmem_capacity_bytes)
    except Exception:  # detection failure only affects the perf hint
        cap = 64 * 1024 * 1024  # conservative: v7x per-TensorCore VMEM
    want = max(int(required_bytes), 32 * 1024 * 1024)
    return int(min(want, cap * 3 // 4))  # leave headroom for internal scratch


def _corr_mm_kernel(w_ref, p_ref, o_ref, acc_ref):
    """One (batch b, pixel-tile n, reduction-tile k) grid step.

    w_ref  : VMEM (1, K, tk)    per-batch filter slab (matmul LHS)
    p_ref  : VMEM (1, tk, tn)   im2col patch slab (matmul RHS, lane-dense pixels)
    o_ref  : VMEM (1, K, tn)    lane-dense output slab
    acc_ref: VMEM (K, tn) f32   MXU accumulator, resident across the k axis
    """
    @pl.when(pl.program_id(2) == 0)
    def _init():
        acc_ref[...] = jnp.zeros_like(acc_ref)

    acc_ref[...] += jnp.dot(w_ref[0], p_ref[0],
                            preferred_element_type=jnp.float32)

    @pl.when(pl.program_id(2) == pl.num_programs(2) - 1)
    def _store():
        o_ref[0] = acc_ref[...].astype(o_ref.dtype)


def correlation_forward(x, kernel, *, padding=0, tile_n=None, tile_k=None):
    """Per-batch 2-D cross correlation (the Correlation core of DRConv2d).

    out[b, k, i, j] = sum_{c,di,dj} x_pad[b, c, i+di, j+dj] * kernel[b, k*C+c, di, dj]

    padding=1 is the path actually used by DRConv2d/up_conv_DR
    (Correlation(use_slow=False)); padding=0 is the xcorr_slow variant.
    """
    B, C, H, W = x.shape
    Bk, KC, KH, KW = kernel.shape
    assert Bk == B and KC % C == 0, "kernel must be (B, K*C, kh, kw)"
    K = KC // C
    out_dtype = x.dtype

    if padding:
        x = jnp.pad(x, ((0, 0), (0, 0), (padding, padding), (padding, padding)))
    Hp, Wp = H + 2 * padding, W + 2 * padding
    HO, WO = Hp - KH + 1, Wp - KW + 1
    N = HO * WO
    CK = C * KH * KW

    # MXU operands stay in the inputs' (promoted) dtype -- no VPU upcast; the
    # dot accumulates in f32 regardless (bf16 inputs feed the MXU natively).
    cdt = jnp.promote_types(x.dtype, kernel.dtype)

    # ---- wrapper-side im2col relayout: lane-dense (HO*WO)-last layout -------
    # Taps ordered (c, di, dj) to match kernel.view(K, C, KH, KW) flattening.
    taps = [x[:, :, di:di + HO, dj:dj + WO]
            for di in range(KH) for dj in range(KW)]
    patches = jnp.stack(taps, axis=2).reshape(B, CK, N).astype(cdt)
    w = kernel.reshape(B, K, CK).astype(cdt)

    # ---- tile selection ------------------------------------------------------
    # Pixel (lane) tiles: multiples of 128.
    if tile_n is None:
        tile_n = min(_round_up(N, 128), 2048)
    tn = _round_up(tile_n, 128)
    Np = _round_up(N, tn)

    # Reduction (C*KH*KW) tiles: the tile is the lane dim of the weight block,
    # so it must either cover the whole (padded) axis or be a multiple of 128.
    if tile_k is None:
        if CK <= 1024:
            tk, CKp = CK, CK          # single reduction step, full-dim block
        else:
            tk = 512
            CKp = _round_up(CK, tk)
    else:
        tk = _round_up(tile_k, 128)
        CKp = _round_up(CK, tk)

    if Np != N:
        patches = jnp.pad(patches, ((0, 0), (0, 0), (0, Np - N)))
    if CKp != CK:
        patches = jnp.pad(patches, ((0, 0), (0, CKp - CK), (0, 0)))
        w = jnp.pad(w, ((0, 0), (0, 0), (0, CKp - CK)))

    grid = (B, Np // tn, CKp // tk)

    # ---- explicit scoped-VMEM budget (double-buffered blocks + accumulator) -
    isz = jnp.dtype(cdt).itemsize
    osz = jnp.dtype(out_dtype).itemsize
    block_bytes = (2 * (K * tk * isz)       # weight blocks
                   + 2 * (tk * tn * isz)    # patch blocks
                   + 2 * (K * tn * osz)     # output blocks
                   + K * tn * 4)            # f32 accumulator scratch
    vmem_limit = _scoped_vmem_limit(2 * block_bytes)

    cost = pl.CostEstimate(
        flops=int(2 * B * K * CKp * Np),
        transcendentals=0,
        bytes_accessed=int(w.size * isz + patches.size * isz + B * K * Np * osz))

    out = pl.pallas_call(
        _corr_mm_kernel,
        out_shape=jax.ShapeDtypeStruct((B, K, Np), out_dtype),
        grid=grid,
        in_specs=[
            pl.BlockSpec((1, K, tk), lambda b, n, k: (b, 0, k)),
            pl.BlockSpec((1, tk, tn), lambda b, n, k: (b, k, n)),
        ],
        out_specs=pl.BlockSpec((1, K, tn), lambda b, n, k: (b, 0, n)),
        scratch_shapes=[pltpu.VMEM((K, tn), jnp.float32)],
        compiler_params=pltpu.CompilerParams(
            dimension_semantics=("parallel", "parallel", "arbitrary"),
            vmem_limit_bytes=vmem_limit),
        cost_estimate=cost,
    )(w, patches)

    # Drop the lane padding and restore NCHW.
    return out[:, :, :N].reshape(B, K, HO, WO)


def _reference_corr(x, kernel, padding):
    """Plain-JAX reference: per-batch F.conv2d(x[b], kernel[b].view(K,C,kh,kw))."""
    B, C, _, _ = x.shape
    K = kernel.shape[1] // C
    KH, KW = kernel.shape[2], kernel.shape[3]
    xp = (jnp.pad(x, ((0, 0), (0, 0), (padding,) * 2, (padding,) * 2))
          if padding else x)
    HO = xp.shape[2] - KH + 1
    WO = xp.shape[3] - KW + 1
    wr = kernel.reshape(B, K, C, KH, KW).astype(jnp.float32)
    out = jnp.zeros((B, K, HO, WO), jnp.float32)
    for di in range(KH):
        for dj in range(KW):
            out = out + jnp.einsum(
                "bcij,bkc->bkij",
                xp[:, :, di:di + HO, dj:dj + WO].astype(jnp.float32),
                wr[:, :, :, di, dj],
                precision=lax.Precision.HIGHEST)
    return out


def _max_rel_err(out, ref):
    out = out.astype(jnp.float32)
    return float(jnp.max(jnp.abs(out - ref)) / (jnp.max(jnp.abs(ref)) + 1e-6))


if __name__ == "__main__":
    key = jax.random.PRNGKey(0)
    kx, kk, kx2, kk2 = jax.random.split(key, 4)

    # Shapes consistent with DRConv2d's corr() call inside up_conv_DR:
    #   x      : (B, C, H, W)      feature map (post-Upsample)
    #   kernel : (B, K*C, 3, 3)    per-batch generated filter bank -> K outputs
    B, C, H, W = 2, 4, 16, 16
    K, KH, KW = 2, 3, 3
    x = jax.random.normal(kx, (B, C, H, W), dtype=jnp.float32)
    kern = jax.random.normal(kk, (B, K * C, KH, KW), dtype=jnp.float32)

    # Loose-ish thresholds: structural/indexing bugs produce O(1) errors, while
    # legitimate MXU pass/rounding differences across generations stay << 1e-2.
    TOL = 1e-2

    # 1) Module path: padding=1 (Correlation(use_slow=False) / Corr.apply).
    out1 = jax.block_until_ready(correlation_forward(x, kern, padding=1))
    ref1 = _reference_corr(x, kern, padding=1)
    assert out1.shape == (B, K, H, W), out1.shape
    assert _max_rel_err(out1, ref1) < TOL, _max_rel_err(out1, ref1)

    # 2) xcorr_slow variant: padding=0, HO*WO=196 (non-multiple of 128 -> lane pad).
    out0 = jax.block_until_ready(correlation_forward(x, kern, padding=0))
    ref0 = _reference_corr(x, kern, padding=0)
    assert out0.shape == (B, K, H - KH + 1, W - KW + 1), out0.shape
    assert _max_rel_err(out0, ref0) < TOL, _max_rel_err(out0, ref0)

    # 3) Exercise the multi-tile pipelined path (pixel tiles + multi-step
    #    reduction axis with accumulator init/finalize) at larger channels.
    C2, K2 = 32, 4
    x2 = jax.random.normal(kx2, (B, C2, H, W), dtype=jnp.float32)
    kern2 = jax.random.normal(kk2, (B, K2 * C2, KH, KW), dtype=jnp.float32)
    out2 = jax.block_until_ready(
        correlation_forward(x2, kern2, padding=1, tile_n=128, tile_k=128))
    ref2 = _reference_corr(x2, kern2, padding=1)
    assert out2.shape == (B, K2, H, W), out2.shape
    assert _max_rel_err(out2, ref2) < TOL, _max_rel_err(out2, ref2)

    print("KERNEL_OK")
</pallas_src>

<mosaic_0001>
module attributes {stable_mosaic.version = 11 : i64} {
  func.func @_corr_mm_kernel(%arg0: i32, %arg1: i32, %arg2: i32, %arg3: memref<1x2x36xf32, #tpu.memory_space<vmem>>, %arg4: memref<1x36x256xf32, #tpu.memory_space<vmem>>, %arg5: memref<1x2x256xf32, #tpu.memory_space<vmem>>, %arg6: memref<2x256xf32, #tpu.memory_space<vmem>>) attributes {dimension_semantics = [#tpu.dimension_semantics<parallel>, #tpu.dimension_semantics<parallel>, #tpu.dimension_semantics<arbitrary>], iteration_bounds = array<i64: 2, 1, 1>, scalar_prefetch = 0 : i64, scratch_operands = 1 : i64, tpu.core_type = #tpu.core_type<tc>, window_params = [{transform_indices = @transform_0, window_bounds = array<i64: 1, 2, 36>}, {transform_indices = @transform_1, window_bounds = array<i64: 1, 36, 256>}, {transform_indices = @transform_2, window_bounds = array<i64: 1, 2, 256>}]} {
    %c0_i32 = arith.constant 0 : i32
    %0 = arith.cmpi eq, %arg2, %c0_i32 : i32
    %1 = arith.extui %0 : i1 to i32
    %c0_i32_0 = arith.constant 0 : i32
    %2 = arith.cmpi ne, %1, %c0_i32_0 : i32
    scf.if %2 {
      %cst_12 = arith.constant 0.000000e+00 : f32
      %14 = vector.broadcast %cst_12 : f32 to vector<2x256xf32>
      %c0_13 = arith.constant 0 : index
      %c0_14 = arith.constant 0 : index
      %15 = vector.load %arg6[%c0_13, %c0_14] : memref<2x256xf32, #tpu.memory_space<vmem>>, vector<2x256xf32>
      tpu.vector_store %arg6[%c0_13, %c0_14], %14 {strides = array<i32>} : memref<2x256xf32, #tpu.memory_space<vmem>>, vector<2x256xf32>,
    } else {
    }
    %c0 = arith.constant 0 : index
    %c0_1 = arith.constant 0 : index
    %3 = vector.load %arg6[%c0, %c0_1] : memref<2x256xf32, #tpu.memory_space<vmem>>, vector<2x256xf32>
    %c0_2 = arith.constant 0 : index
    %c0_3 = arith.constant 0 : index
    %c0_4 = arith.constant 0 : index
    %4 = vector.load %arg3[%c0_2, %c0_3, %c0_4] : memref<1x2x36xf32, #tpu.memory_space<vmem>>, vector<1x2x36xf32>
    %5 = vector.shape_cast %4 : vector<1x2x36xf32> to vector<2x36xf32>
    %c0_5 = arith.constant 0 : index
    %c0_6 = arith.constant 0 : index
    %c0_7 = arith.constant 0 : index
    %6 = vector.load %arg4[%c0_5, %c0_6, %c0_7] : memref<1x36x256xf32, #tpu.memory_space<vmem>>, vector<1x36x256xf32>
    %7 = vector.shape_cast %6 : vector<1x36x256xf32> to vector<36x256xf32>
    %cst = arith.constant dense<0.000000e+00> : vector<2x256xf32>
    %8 = tpu.matmul %5, %7, %cst {dimension_numbers = #tpu.dot_dimension_numbers<[1], [0], [0], [1], [0, 0, 1, 1], [], []>} : vector<2x36xf32>, vector<36x256xf32>, vector<2x256xf32> -> vector<2x256xf32>
    %9 = arith.addf %3, %8 : vector<2x256xf32>
    %c0_8 = arith.constant 0 : index
    %c0_9 = arith.constant 0 : index
    %10 = vector.load %arg6[%c0_8, %c0_9] : memref<2x256xf32, #tpu.memory_space<vmem>>, vector<2x256xf32>
    tpu.vector_store %arg6[%c0_8, %c0_9], %9 {strides = array<i32>} : memref<2x256xf32, #tpu.memory_space<vmem>>, vector<2x256xf32>,
    %c0_i32_10 = arith.constant 0 : i32
    %11 = arith.cmpi eq, %arg2, %c0_i32_10 : i32
    %12 = arith.extui %11 : i1 to i32
    %c0_i32_11 = arith.constant 0 : i32
    %13 = arith.cmpi ne, %12, %c0_i32_11 : i32
    scf.if %13 {
      %c0_12 = arith.constant 0 : index
      %c0_13 = arith.constant 0 : index
      %14 = vector.load %arg6[%c0_12, %c0_13] : memref<2x256xf32, #tpu.memory_space<vmem>>, vector<2x256xf32>
      %c0_14 = arith.constant 0 : index
      %c0_15 = arith.constant 0 : index
      %c0_16 = arith.constant 0 : index
      %15 = vector.load %arg5[%c0_14, %c0_15, %c0_16] : memref<1x2x256xf32, #tpu.memory_space<vmem>>, vector<1x2x256xf32>
      %16 = vector.shape_cast %15 : vector<1x2x256xf32> to vector<2x256xf32>
      %17 = vector.shape_cast %14 : vector<2x256xf32> to vector<1x2x256xf32>
      tpu.vector_store %arg5[%c0_14, %c0_15, %c0_16], %17 {strides = array<i32>} : memref<1x2x256xf32, #tpu.memory_space<vmem>>, vector<1x2x256xf32>,
    } else {
    }
    return
  }
  func.func @transform_0(%arg0: i32, %arg1: i32, %arg2: i32) -> (i32, i32, i32) {
    %c0_i32 = arith.constant 0 : i32
    %c0_i32_0 = arith.constant 0 : i32
    return %arg0, %c0_i32, %arg2 : i32, i32, i32
  }
  func.func @transform_1(%arg0: i32, %arg1: i32, %arg2: i32) -> (i32, i32, i32) {
    %c0_i32 = arith.constant 0 : i32
    return %arg0, %arg2, %arg1 : i32, i32, i32
  }
  func.func @transform_2(%arg0: i32, %arg1: i32, %arg2: i32) -> (i32, i32, i32) {
    %c0_i32 = arith.constant 0 : i32
    %c0_i32_0 = arith.constant 0 : i32
    return %arg0, %c0_i32, %arg1 : i32, i32, i32
  }
}

</mosaic_0001>

<bundles_post_ra>
// kernel: tpu_custom_call.1
= control target key start
LH: loop header
LB: loop body
LE: loop exit
PB: predicated region body
PF: predicated region fallthrough
CT: control target
= control target key end

     0   :  { %7 = vsyncpa [#allocation4], 0  ;;  %s757_s0 = inlined_call_operand.vmem [shape: f32[2,2,36], index: 0, kind: input, shape index: {}]   ;;  %s758_s1 = inlined_call_operand.vmem [shape: f32[2,36,256], index: 1, kind: input, shape index: {}]   ;;  %s759_s2 = inlined_call_operand.hbm [shape: f32[2,2,256], index: 2, kind: output, shape index: {}]  }
   0x1   :  { %9 = vsyncpa [#allocation4 + $0x1], 0  ;;  %s642_s9 = smov 0   ;;  %s644_s10 = smov 0  }
   0x2   :  { %s646_s11 = smov 0   ;;  %s648_s12 = smov 0  }
   0x3   :  { %s650_s13 = smov 0   ;;  %s652_s14 = smov 0  }
   0x4 LB: > { %s461_s15 = sadd.s32 4294967295, %s622_s14   ;;  %s462_s16 = sadd.s32 4294967294, %s622_s14   ;;  %s622_s14 = sphi %s652_s14, %s15_s14   ;;  %s618_s13 = sphi %s650_s13, %s766_s13   ;;  %s614_s12 = sphi %s648_s12, %s765_s12   ;;  %s610_s11 = sphi %s646_s11, %s764_s11   ;;  %s606_s10 = sphi %s644_s10, %s763_s10   ;;  %s602_s9 = sphi %s642_s9, %s762_s9  }
   0x5   : > { %s34_s17 = sadd.s32 1, %s618_s13  ;;  %s101_s18 = sadd.s32 1, %s610_s11 }
   0x6   : > { %p36_p0 = scmp.ge.s32.totalorder %s34_s17, 2  ;;  %p111_p1 = scmp.ne.s32.totalorder %s610_s11, %s606_s10 }
   0x7   : > { %p112_p2 = scmp.eq.s32.totalorder %s461_s15, 1  ;;  %p117_p3 = scmp.ne.s32.totalorder %s606_s10, %s602_s9 }
   0x8   : > { %s768_s17 = smov (%p36_p0, %s34_s17), 0  ;;  %p118_p5 = scmp.eq.s32.totalorder %s462_s16, 1 }
   0x9   : > { %p682_p4 = por %p112_p2, %p111_p1  ;;  %s96_s20 = ssub.s32 %s618_s13, %s768_s17 }
   0xa   : > { %p465_p6 = scmp.ge.s32.totalorder %s622_s14, 1  ;;  %p99_p7 = scmp.eq.s32.totalorder %s96_s20, 0 }
   0xb   : > { %p689_p8 = por %p118_p5, %p117_p3  ;;  %p165_p9 = scmp.lt.s32.totalorder %s622_s14, 3 }
   0xc   : > { %s695_s22 = scalar_select %p99_p7, %s610_s11, %s101_s18  }
   0xd   : > { %p166_p10 = pnand %p465_p6, %p165_p9 }
   0xe   : > { %p203_p11 = scmp.lt.s32.totalorder (!%p166_p10), %s614_s12, 1  ;;  %v624_v0 = vmov (!%p166_p10), 0.0   ;;  %vm248_vm0 = vcmask (!%p166_p10), 1043456   ;;  %vm244_vm1 = vcmask (!%p166_p10), 293888   ;;  %v625_v16 = vmov (!%p166_p10), 1983009808  }
   0xf   : > { %169 = sbr.rel (%p166_p10) target bundleno = 281 (0x119), region = 28  ;;  %231 = vst [vmem:[#allocation2] sm:$0xf] (!%p166_p10), %v624_v0  ;;  %319 = vmatprep.mubr.f32.mxu0 (!%p166_p10), %v624_v0  ;;  %v330_v17 = vunpack.c.l.s4 (!%p166_p10), %v625_v16  ;;  %v332_v18 = vlaneseq (!%p166_p10)  ;;  %s200_s4 = sand.u32 (!%p166_p10), 1, %s606_s10  }
  0x10   : > { %s466_s5 = sshll.u32 (!%p166_p10), %s200_s4, 2  ;;  %s477_s6 = sshll.u32 (!%p166_p10), %s614_s12, 6 }
  0x11   : > { %v331_v19 = vunpack.c.0.s8 (!%p166_p10), %v330_v17  ;;  %v333_v20 = vshrl.u32 (!%p166_p10), %v332_v18, 7  ;;  %s202_s7 = scalar_lea.vmem (!%p166_p10), [#allocation3], %s466_s5  ;;  %s710_s18 = scalar_lea.hbm (!%p166_p10), %s759_s2, %s477_s6 }
  0x12   : > { %s361_s8 = sshll.u32 (!%p166_p10), %s202_s7, 4  ;;  %s345_s20 = scalar_lea.sflag (!%p166_p10), [#allocation4], %s200_s4  ;;  %s712_s8 = int_to_ptr.vmem [resolvable:$true] %s361_s8 }
  0x13   : > { %v334_v22 = vsub.s32 (!%p166_p10), %v331_v19, %v333_v20 }
  0x16   : > { %s204_s23 = scalar_select %p203_p11, %s614_s12, 1  ;;  %v232_v25 = vld [vmem:[#allocation2] sm:$0xf] }
  0x17   : > { %s626_s12 = smov [#allocation3]  }
  0x18   : > { %s486_s24 = smul.u32 80, %s204_s23  ;;  %s467_s28 = sshll.u32 %s204_s23, 1 }
  0x19   : > { %s209_s3 = scalar_lea.vmem %s757_s0, %s467_s28  ;;  %s544_s23 = scalar_lea.vmem %s712_s8, 64 }
  0x1a   : > { %s223_s27 = scalar_lea.vmem %s758_s1, %s486_s24  ;;  %v233_v15 = vld [vmem:[%s209_s3] sm:$0x3]  ;;  %p545_p12 = scmp.ne.s32.totalorder %s712_s8, %s544_s23 }
  0x1b   : > { %v235_v1 = vld [vmem:[%s223_s27 + $0x8] sm:$0xff]  ;;  %v237_v2 = vld [vmem:[%s223_s27 + $0x18] sm:$0xff]  ;;  %v234_v3 = vld [vmem:[%s223_s27] sm:$0xff]  ;;  %s548_s24 = sshll.u32 %s626_s12, 4  ;;  %s549_s24 = int_to_ptr.vmem [resolvable:$false] %s548_s24 }
  0x1c   : > { %v478_v4 = vpack.c.bf16 %v237_v2, %v235_v1  ;;  %v236_v5 = vld [vmem:[%s223_s27 + $0x10] sm:$0xff]  ;;  %v239_v6 = vld [vmem:[%s223_s27 + $0x28] sm:$0xff]  ;;  %v241_v7 = vld [vmem:[%s223_s27 + $0x38] sm:$0xff]  ;;  %p546_p13 = pnand %p545_p12, %p682_p4  ;;  %s550_s25 = scalar_lea.vmem %s549_s24, 128 }
  0x1d   : > { %v480_v8 = vpack.c.bf16 %v236_v5, %v234_v3  ;;  %v482_v9 = vpack.c.bf16 %v241_v7, %v239_v6  ;;  %v238_v10 = vld [vmem:[%s223_s27 + $0x20] sm:$0xff]  ;;  %v240_v11 = vld [vmem:[%s223_s27 + $0x30] sm:$0xff]  ;;  %v243_v13 = vld [vmem:[%s223_s27 + $0x48] sm:$0xf]  ;;  %p551_p1 = scmp.lt.s32.totalorder %s712_s8, %s549_s24  ;;  %p552_p2 = scmp.lt.s32.totalorder %s550_s25, %s544_s23 }
  0x1e   : > { %479 = vmatprep.subr.bf16.mxu0 %v478_v4  ;;  %v484_v12 = vpack.c.bf16 %v240_v11, %v238_v10  ;;  %v242_v14 = vld [vmem:[%s223_s27 + $0x40] sm:$0xf]  ;;  %p547_p0 = pneg %p546_p13 }
  0x1f   : > { %481 = vmatpush1.bf16.msra.mxu0 %v480_v8  ;;  %p553_p3 = por %p552_p2, %p551_p1 }
  0x20   : > { %483 = vmatprep.subr.bf16.mxu0 %v482_v9 }
  0x21   : > { %p554_p5 = pnand %p553_p3, %p547_p0 }
  0x23   : > { %485 = vmatpush1.bf16.msra.mxu0 %v484_v12 }
  0x24   : > { %469 = vmatprep.subr.msk.mxu0 %vm248_vm0, %v243_v13 }
  0x27   : > { %470 = vmatpush1.msk.msra.mxu0 %vm248_vm0, %v242_v14 }
  0x28   : > { %471 = vmatmul.mubr.msk.f32.vlgmr.msra.gmra.mrb[0].mxu0 %vm244_vm1, %v233_v15 }
  0xfb   : > { %v321_v21 = vpop.f32.mrb[0].mxu0 }
  0xfc   : > { %v323_v23 = vpop.f32.mrb[1].mxu0 }
  0xfd   : > { %v328_v24 = vcombine.low %v321_v21, %v323_v23 }
  0xff   : > { %v335_v26 = vrot.slane %v328_v24, %v334_v22 }
 0x101   : > { %v337_v27 = vadd.f32 %v335_v26, %v232_v25 }
 0x103   : > { %338 = vst [vmem:[#allocation2] sm:$0xf] %v337_v27 }
 0x10a   : > { %v342_v28 = vld [vmem:[#allocation2] sm:$0xf] }
 0x10b   : > { %343 = vst [vmem:[%s202_s7] sm:$0xf] %v342_v28 }
 0x10c   : > { %557 = shalt.err (!%p554_p5)
}
 0x10d   : > { %s558_s26 = scalar_lea.hbm %s710_s18, 64  ;;  %s562_s29 = scalar_lea.hbm %s759_s2, 128 }
 0x10e   : > { %p559_p6 = scmp.ne.s32.totalorder %s710_s18, %s558_s26  ;;  %p563_p10 = scmp.lt.u32.totalorder %s710_s18, %s759_s2 }
 0x10f   : > { %p564_p11 = scmp.lt.u32.totalorder %s562_s29, %s558_s26  ;;  %p566_p13 = scmp.lt.u32.totalorder %s558_s26, %s710_s18 }
 0x110   : > { %p560_p7 = pnand %p559_p6, %p682_p4 }
 0x111   : > { %p565_p12 = por %p564_p11, %p563_p10 }
 0x112   : > { %p561_p9 = pneg %p560_p7 }
 0x113   : > { %p567_p0 = por %p566_p13, %p565_p12 }
 0x115   : > { %p568_p1 = pnand %p567_p0, %p561_p9 }
 0x117   : > { %571 = shalt.err (!%p568_p1)
}
 0x118   : > { %487 = dma.vmem_to_hbm [thread:$0]  (%p682_p4), %s712_s8, 64, %s710_s18, %s345_s20  }
 0x119 PF: > { %p493_p2 = scmp.ge.s32.totalorder %s622_s14, 2  ;;  %s373_s4 = sand.u32 1, %s602_s9  }
 0x11a   : > { %s374_s5 = scalar_lea.sflag [#allocation4], %s373_s4 }
 0x11b   : > { %p490_p3 = pnand %p493_p2, %p689_p8 }
 0x11d   : > { %597 = dma.done.wait (!%p490_p3), %s374_s5, 64  }
 0x11e   : > { %599 = vsyncadd (!%p490_p3), %s374_s5, 4294967232  ;;  %s15_s14 = sadd.s32 1, %s622_s14   ;;  %s762_s9 = smov %s606_s10 }
 0x11f   : > { %p12_p5 = scmp.ge.s32.totalorder %s15_s14, 4   ;;  %s763_s10 = smov %s610_s11 }
 0x120   : > { %s764_s11 = smov %s695_s22  ;;  %s765_s12 = smov %s618_s13 }
 0x121   : > { %s766_s13 = smov %s768_s17  ;;  %14 = sbr.rel (!%p12_p5) target bundleno = 4 (0x4), region = 74 }
 0x128   :  { %379 = vsyncpa [#allocation4], 1 }
 0x129   :  { %381 = vsyncpa [#allocation4 + $0x1], 1 }

</bundles_post_ra>
